<compile_context>
chip_gen: v6e
topology: v6e:2x2x1
jax: 0.10.0
libtpu: 0.0.40
codegen_flags: <defaults>
</compile_context>

<pallas_src>
import random

import jax
import jax.numpy as jnp
from jax import lax
from jax.experimental import pallas as pl
from jax.experimental.pallas import tpu as pltpu


_VMEM = pl.BlockSpec(memory_space=pltpu.MemorySpace.VMEM)


# ------------------------------------------------------------------ #
# Encoder kernel: GRU over the source sequence, input projection hoisted
# ------------------------------------------------------------------ #
def encoder_kernel(emb_ref, w_ih_ref, w_hh_ref, b_ih_ref, b_hh_ref,
                   enc_out_ref, h_final_ref, h_scr, gi_scr):
    """emb_ref: [S,B,E] time-major embedded source.
    w_ih_ref: [E,3H], w_hh_ref: [H,3H], biases [1,3H]  (gate order r,z,n).
    enc_out_ref: [S,B,H], h_final_ref: [B,H]."""
    S, B, E = emb_ref.shape
    H = w_hh_ref.shape[0]

    # Hoisted input projection: one big matmul instead of 3*S slivers.
    x2 = emb_ref[...].reshape(S * B, E)
    gi_all = jnp.dot(x2, w_ih_ref[...], preferred_element_type=jnp.float32) + b_ih_ref[...]
    gi_scr[...] = gi_all.reshape(S, B, 3 * H)

    h_scr[...] = jnp.zeros_like(h_scr)

    def body(t, carry):
        h = h_scr[...]                                                    # [B,H]
        gi = gi_scr[t]                                                    # [B,3H]
        gh = jnp.dot(h, w_hh_ref[...],
                     preferred_element_type=jnp.float32) + b_hh_ref[...]  # [B,3H]
        r = jax.nn.sigmoid(gi[:, :H] + gh[:, :H])
        z = jax.nn.sigmoid(gi[:, H:2 * H] + gh[:, H:2 * H])
        n = jnp.tanh(gi[:, 2 * H:] + r * gh[:, 2 * H:])
        h_new = (1.0 - z) * n + z * h
        h_scr[...] = h_new
        enc_out_ref[t] = h_new
        return carry

    lax.fori_loop(0, S, body, 0)
    h_final_ref[...] = h_scr[...]


def run_encoder(emb_t, w_ih, w_hh, b_ih, b_hh):
    S, B, _ = emb_t.shape
    H = w_hh.shape[0]
    return pl.pallas_call(
        encoder_kernel,
        out_shape=(jax.ShapeDtypeStruct((S, B, H), jnp.float32),
                   jax.ShapeDtypeStruct((B, H), jnp.float32)),
        in_specs=[_VMEM] * 5,
        out_specs=(_VMEM, _VMEM),
        scratch_shapes=[pltpu.VMEM((B, H), jnp.float32),
                        pltpu.VMEM((S, B, 3 * H), jnp.float32)],
    )(emb_t, w_ih, w_hh, b_ih, b_hh)


# ------------------------------------------------------------------ #
# Fused decoder kernel: grid=(T-1,), weights/enc_out resident, hidden carried
# ------------------------------------------------------------------ #
def decoder_kernel(tf_ref,                       # SMEM scalar prefetch: [T-1] int32
                   tgt_emb_ref,                  # [1,B,E]  teacher embedding for this step
                   h0_ref,                       # [B,H]    encoder final hidden
                   enc_ref,                      # [S,B,H]  encoder outputs (resident)
                   dec_emb_ref,                  # [V,E]    decoder embedding table (resident)
                   w_ih_e_ref, w_ih_c_ref,       # [E,3H], [H,3H]
                   w_hh_ref,                     # [H,3H]
                   b_ih_ref, b_hh_ref,           # [1,3H]
                   w_out_h_ref, w_out_c_ref,     # [H,V], [H,V]
                   b_out_ref,                    # [1,V]
                   logits_ref,                   # out: [1,B,V]
                   h_scr, gen_emb_scr):          # scratch: [B,H], [B,E]
    s = pl.program_id(0)
    H = h0_ref.shape[-1]
    V = dec_emb_ref.shape[0]
    B = h0_ref.shape[0]

    @pl.when(s == 0)
    def _():
        h_scr[...] = h0_ref[...]
        gen_emb_scr[...] = jnp.zeros_like(gen_emb_scr)

    # --- select decoder input embedding: teacher token vs previously generated token ---
    tf_f = (tf_ref[s] > 0).astype(jnp.float32)
    emb = tf_f * tgt_emb_ref[0] + (1.0 - tf_f) * gen_emb_scr[...]          # [B,E]
    h = h_scr[...]                                                          # [B,H]
    enc = enc_ref[...]                                                      # [S,B,H]

    # --- dot-product attention over source positions ---
    scores = jnp.sum(enc * h[None, :, :], axis=-1)                          # [S,B]
    scores = scores - jnp.max(scores, axis=0, keepdims=True)
    e = jnp.exp(scores)
    alpha = e * pl.reciprocal(jnp.sum(e, axis=0, keepdims=True), approx=True)
    context = jnp.sum(alpha[:, :, None] * enc, axis=0)                      # [B,H]

    # --- GRU step (packed gates, split input weights -> no concatenate) ---
    gi = (jnp.dot(emb, w_ih_e_ref[...], preferred_element_type=jnp.float32)
          + jnp.dot(context, w_ih_c_ref[...], preferred_element_type=jnp.float32)
          + b_ih_ref[...])                                                  # [B,3H]
    gh = jnp.dot(h, w_hh_ref[...],
                 preferred_element_type=jnp.float32) + b_hh_ref[...]        # [B,3H]
    r = jax.nn.sigmoid(gi[:, :H] + gh[:, :H])
    z = jax.nn.sigmoid(gi[:, H:2 * H] + gh[:, H:2 * H])
    n = jnp.tanh(gi[:, 2 * H:] + r * gh[:, 2 * H:])
    h_new = (1.0 - z) * n + z * h
    h_scr[...] = h_new

    # --- vocab projection (split weights -> no concatenate) ---
    logits = (jnp.dot(h_new, w_out_h_ref[...], preferred_element_type=jnp.float32)
              + jnp.dot(context, w_out_c_ref[...], preferred_element_type=jnp.float32)
              + b_out_ref[...])                                             # [B,V]
    logits_ref[0] = logits

    # --- on-chip argmax -> one-hot -> embedding for the next (non-teacher) step ---
    maxv = jnp.max(logits, axis=-1, keepdims=True)                          # [B,1]
    iota = lax.broadcasted_iota(jnp.int32, (B, V), 1)
    first_idx = jnp.min(jnp.where(logits == maxv, iota, V), axis=-1, keepdims=True)
    onehot = (iota == first_idx).astype(jnp.float32)                        # [B,V]
    gen_emb_scr[...] = jnp.dot(onehot, dec_emb_ref[...],
                               preferred_element_type=jnp.float32)          # [B,E]


def run_decoder(teacher_flags, tgt_emb_t, h0, enc_out, dec_emb,
                w_ih_e, w_ih_c, w_hh, b_ih, b_hh, w_out_h, w_out_c, b_out):
    Tm1, B, E = tgt_emb_t.shape
    S = enc_out.shape[0]
    H = h0.shape[-1]
    V = w_out_h.shape[-1]

    const2 = lambda s, tf: (0, 0)
    const3 = lambda s, tf: (0, 0, 0)

    grid_spec = pltpu.PrefetchScalarGridSpec(
        num_scalar_prefetch=1,
        grid=(Tm1,),
        in_specs=[
            pl.BlockSpec((1, B, E), lambda s, tf: (s, 0, 0)),   # tgt_emb_t
            pl.BlockSpec((B, H), const2),                       # h0
            pl.BlockSpec((S, B, H), const3),                    # enc_out (resident)
            pl.BlockSpec((V, E), const2),                       # dec_emb (resident)
            pl.BlockSpec((E, 3 * H), const2),                   # w_ih_e
            pl.BlockSpec((H, 3 * H), const2),                   # w_ih_c
            pl.BlockSpec((H, 3 * H), const2),                   # w_hh
            pl.BlockSpec((1, 3 * H), const2),                   # b_ih
            pl.BlockSpec((1, 3 * H), const2),                   # b_hh
            pl.BlockSpec((H, V), const2),                       # w_out_h
            pl.BlockSpec((H, V), const2),                       # w_out_c
            pl.BlockSpec((1, V), const2),                       # b_out
        ],
        out_specs=pl.BlockSpec((1, B, V), lambda s, tf: (s, 0, 0)),
        scratch_shapes=[pltpu.VMEM((B, H), jnp.float32),
                        pltpu.VMEM((B, E), jnp.float32)],
    )
    return pl.pallas_call(
        decoder_kernel,
        grid_spec=grid_spec,
        out_shape=jax.ShapeDtypeStruct((Tm1, B, V), jnp.float32),
        compiler_params=pltpu.CompilerParams(dimension_semantics=("arbitrary",)),
    )(teacher_flags, tgt_emb_t, h0, enc_out, dec_emb,
      w_ih_e, w_ih_c, w_hh, b_ih, b_hh, w_out_h, w_out_c, b_out)


# ------------------------------------------------------------------ #
# Parameters + Seq2Seq forward (mirrors Seq2SeqModel.forward)
# ------------------------------------------------------------------ #
def init_params(key, vocab_size, emb_dim, hidden):
    ks = jax.random.split(key, 14)
    s = 0.1
    f32 = jnp.float32
    return dict(
        enc_embedding=s * jax.random.normal(ks[0], (vocab_size, emb_dim), f32),
        enc_w_ih=s * jax.random.normal(ks[1], (emb_dim, 3 * hidden), f32),
        enc_w_hh=s * jax.random.normal(ks[2], (hidden, 3 * hidden), f32),
        enc_b_ih=s * jax.random.normal(ks[3], (1, 3 * hidden), f32),
        enc_b_hh=s * jax.random.normal(ks[4], (1, 3 * hidden), f32),
        dec_embedding=s * jax.random.normal(ks[5], (vocab_size, emb_dim), f32),
        dec_w_ih_e=s * jax.random.normal(ks[6], (emb_dim, 3 * hidden), f32),
        dec_w_ih_c=s * jax.random.normal(ks[7], (hidden, 3 * hidden), f32),
        dec_w_hh=s * jax.random.normal(ks[8], (hidden, 3 * hidden), f32),
        dec_b_ih=s * jax.random.normal(ks[9], (1, 3 * hidden), f32),
        dec_b_hh=s * jax.random.normal(ks[10], (1, 3 * hidden), f32),
        w_out_h=s * jax.random.normal(ks[11], (hidden, vocab_size), f32),
        w_out_c=s * jax.random.normal(ks[12], (hidden, vocab_size), f32),
        b_out=s * jax.random.normal(ks[13], (1, vocab_size), f32),
    )


def seq2seq_forward(params, input_seq, target_seq,
                    teacher_forcing_ratio=0.5, MAX_LENGTH=None, seed=0):
    """input_seq, target_seq: int32 [batch, seq] (batch-major, like PyTorch)."""
    V = params['w_out_h'].shape[-1]
    B = target_seq.shape[0]
    if MAX_LENGTH is None:
        MAX_LENGTH = target_seq.shape[1]
    if MAX_LENGTH <= 1:
        return jnp.zeros((B, MAX_LENGTH, V), jnp.float32)

    # ---- encoder ----
    emb = jnp.take(params['enc_embedding'], input_seq, axis=0)       # [B,S,E]
    emb_t = jnp.transpose(emb, (1, 0, 2))                            # [S,B,E] time-major
    enc_out, hidden = run_encoder(emb_t, params['enc_w_ih'], params['enc_w_hh'],
                                  params['enc_b_ih'], params['enc_b_hh'])

    # ---- pre-sample teacher-forcing decisions (host RNG, same draw order as PyTorch) ----
    # TODO(synk): original module uses global random.random() per call; deterministic stand-in.
    py_rng = random.Random(seed)
    draws = [py_rng.random() < teacher_forcing_ratio for _ in range(MAX_LENGTH - 1)]
    avail = target_seq.shape[1]
    teacher = [1] + [int(draws[i]) if (i + 1) < avail else 0
                     for i in range(MAX_LENGTH - 2)]
    teacher_flags = jnp.asarray(teacher, dtype=jnp.int32)            # [T-1]

    # ---- pre-gather teacher-token embeddings for steps 0..T-2 ----
    if avail < MAX_LENGTH:
        pad = jnp.zeros((B, MAX_LENGTH - avail), target_seq.dtype)
        target_padded = jnp.concatenate([target_seq, pad], axis=1)
    else:
        target_padded = target_seq
    tgt_tokens = target_padded[:, :MAX_LENGTH - 1]                   # [B,T-1]
    tgt_emb = jnp.take(params['dec_embedding'], tgt_tokens, axis=0)  # [B,T-1,E]
    tgt_emb_t = jnp.transpose(tgt_emb, (1, 0, 2))                    # [T-1,B,E]

    # ---- fused decoder: one pallas_call over all T-1 steps ----
    logits_all = run_decoder(
        teacher_flags, tgt_emb_t, hidden, enc_out, params['dec_embedding'],
        params['dec_w_ih_e'], params['dec_w_ih_c'], params['dec_w_hh'],
        params['dec_b_ih'], params['dec_b_hh'],
        params['w_out_h'], params['w_out_c'], params['b_out'])       # [T-1,B,V]

    out_tail = jnp.transpose(logits_all, (1, 0, 2))                  # [B,T-1,V]
    outputs = jnp.concatenate([jnp.zeros((B, 1, V), jnp.float32), out_tail], axis=1)
    return outputs


# ------------------------------------------------------------------ #
if __name__ == "__main__":
    # Lane/sublane-dense small shapes: B multiple of 8, E/H/V multiples of 128.
    BATCH, SRC_LEN, TGT_LEN = 8, 8, 8
    VOCAB, EMB, HIDDEN = 128, 128, 128

    key = jax.random.PRNGKey(0)
    kp, ki, kt = jax.random.split(key, 3)
    params = init_params(kp, VOCAB, EMB, HIDDEN)

    input_seq = jax.random.randint(ki, (BATCH, SRC_LEN), 0, VOCAB, dtype=jnp.int32)
    target_seq = jax.random.randint(kt, (BATCH, TGT_LEN), 0, VOCAB, dtype=jnp.int32)

    out = seq2seq_forward(params, input_seq, target_seq,
                          teacher_forcing_ratio=0.5, MAX_LENGTH=None, seed=0)
    out = jax.block_until_ready(out)

    assert out.shape == (BATCH, TGT_LEN, VOCAB)
    assert bool(jnp.all(jnp.isfinite(out)))
    # TODO(synk): encoder/decoder submodules were not given in the spec; a GRU encoder and a
    # dot-product-attention GRU decoder were instantiated to realize the forward loop.
    print("KERNEL_OK")
</pallas_src>

<mosaic_0001>
module attributes {stable_mosaic.version = 11 : i64} {
  func.func @encoder_kernel(%arg0: memref<8x8x128xf32, #tpu.memory_space<vmem>>, %arg1: memref<128x384xf32, #tpu.memory_space<vmem>>, %arg2: memref<128x384xf32, #tpu.memory_space<vmem>>, %arg3: memref<1x384xf32, #tpu.memory_space<vmem>>, %arg4: memref<1x384xf32, #tpu.memory_space<vmem>>, %arg5: memref<8x8x128xf32, #tpu.memory_space<vmem>>, %arg6: memref<8x128xf32, #tpu.memory_space<vmem>>, %arg7: memref<8x128xf32, #tpu.memory_space<vmem>>, %arg8: memref<8x8x384xf32, #tpu.memory_space<vmem>>) attributes {dimension_semantics = [], scalar_prefetch = 0 : i64, scratch_operands = 2 : i64, tpu.core_type = #tpu.core_type<tc>} {
    %c0 = arith.constant 0 : index
    %c0_0 = arith.constant 0 : index
    %c0_1 = arith.constant 0 : index
    %0 = vector.load %arg0[%c0, %c0_0, %c0_1] : memref<8x8x128xf32, #tpu.memory_space<vmem>>, vector<8x8x128xf32>
    %1 = vector.shape_cast %0 : vector<8x8x128xf32> to vector<64x128xf32>
    %c0_2 = arith.constant 0 : index
    %c0_3 = arith.constant 0 : index
    %2 = vector.load %arg1[%c0_2, %c0_3] : memref<128x384xf32, #tpu.memory_space<vmem>>, vector<128x384xf32>
    %cst = arith.constant dense<0.000000e+00> : vector<64x384xf32>
    %3 = tpu.matmul %1, %2, %cst {dimension_numbers = #tpu.dot_dimension_numbers<[1], [0], [0], [1], [0, 0, 1, 1], [], []>} : vector<64x128xf32>, vector<128x384xf32>, vector<64x384xf32> -> vector<64x384xf32>
    %c0_4 = arith.constant 0 : index
    %c0_5 = arith.constant 0 : index
    %4 = vector.load %arg3[%c0_4, %c0_5] : memref<1x384xf32, #tpu.memory_space<vmem>>, vector<1x384xf32>
    %5 = vector.broadcast %4 : vector<1x384xf32> to vector<64x384xf32>
    %6 = arith.addf %3, %5 : vector<64x384xf32>
    %7 = vector.shape_cast %6 : vector<64x384xf32> to vector<8x8x384xf32>
    %c0_6 = arith.constant 0 : index
    %c0_7 = arith.constant 0 : index
    %c0_8 = arith.constant 0 : index
    %8 = vector.load %arg8[%c0_6, %c0_7, %c0_8] : memref<8x8x384xf32, #tpu.memory_space<vmem>>, vector<8x8x384xf32>
    tpu.vector_store %arg8[%c0_6, %c0_7, %c0_8], %7 {strides = array<i32>} : memref<8x8x384xf32, #tpu.memory_space<vmem>>, vector<8x8x384xf32>,
    %cst_9 = arith.constant 0.000000e+00 : f32
    %9 = vector.broadcast %cst_9 : f32 to vector<8x128xf32>
    %c0_10 = arith.constant 0 : index
    %c0_11 = arith.constant 0 : index
    %10 = vector.load %arg7[%c0_10, %c0_11] : memref<8x128xf32, #tpu.memory_space<vmem>>, vector<8x128xf32>
    tpu.vector_store %arg7[%c0_10, %c0_11], %9 {strides = array<i32>} : memref<8x128xf32, #tpu.memory_space<vmem>>, vector<8x128xf32>,
    %c0_i32 = arith.constant 0 : i32
    %c8_i32 = arith.constant 8 : i32
    %11 = arith.addi %c0_i32, %c8_i32 : i32
    %c1_i32 = arith.constant 1 : i32
    scf.for %arg9 = %c0_i32 to %11 step %c1_i32  : i32 {
      %c0_17 = arith.constant 0 : index
      %c0_18 = arith.constant 0 : index
      %14 = vector.load %arg7[%c0_17, %c0_18] : memref<8x128xf32, #tpu.memory_space<vmem>>, vector<8x128xf32>
      %15 = arith.index_cast %arg9 : i32 to index
      %c0_19 = arith.constant 0 : index
      %c0_20 = arith.constant 0 : index
      %16 = vector.load %arg8[%15, %c0_19, %c0_20] : memref<8x8x384xf32, #tpu.memory_space<vmem>>, vector<1x8x384xf32>
      %17 = vector.shape_cast %16 : vector<1x8x384xf32> to vector<8x384xf32>
      %c0_21 = arith.constant 0 : index
      %c0_22 = arith.constant 0 : index
      %18 = vector.load %arg2[%c0_21, %c0_22] : memref<128x384xf32, #tpu.memory_space<vmem>>, vector<128x384xf32>
      %cst_23 = arith.constant dense<0.000000e+00> : vector<8x384xf32>
      %19 = tpu.matmul %14, %18, %cst_23 {dimension_numbers = #tpu.dot_dimension_numbers<[1], [0], [0], [1], [0, 0, 1, 1], [], []>} : vector<8x128xf32>, vector<128x384xf32>, vector<8x384xf32> -> vector<8x384xf32>
      %c0_24 = arith.constant 0 : index
      %c0_25 = arith.constant 0 : index
      %20 = vector.load %arg4[%c0_24, %c0_25] : memref<1x384xf32, #tpu.memory_space<vmem>>, vector<1x384xf32>
      %21 = vector.broadcast %20 : vector<1x384xf32> to vector<8x384xf32>
      %22 = arith.addf %19, %21 : vector<8x384xf32>
      %23 = vector.extract_strided_slice %17 {offsets = [0, 0], sizes = [8, 128], strides = [1, 1]} : vector<8x384xf32> to vector<8x128xf32>
      %24 = vector.extract_strided_slice %22 {offsets = [0, 0], sizes = [8, 128], strides = [1, 1]} : vector<8x384xf32> to vector<8x128xf32>
      %25 = arith.addf %23, %24 : vector<8x128xf32>
      %26 = arith.negf %25 : vector<8x128xf32>
      %27 = math.exp %26 : vector<8x128xf32>
      %cst_26 = arith.constant 1.000000e+00 : f32
      %28 = vector.broadcast %cst_26 : f32 to vector<8x128xf32>
      %29 = arith.addf %28, %27 : vector<8x128xf32>
      %30 = arith.divf %28, %29 : vector<8x128xf32>
      %31 = vector.extract_strided_slice %17 {offsets = [0, 128], sizes = [8, 128], strides = [1, 1]} : vector<8x384xf32> to vector<8x128xf32>
      %32 = vector.extract_strided_slice %22 {offsets = [0, 128], sizes = [8, 128], strides = [1, 1]} : vector<8x384xf32> to vector<8x128xf32>
      %33 = arith.addf %31, %32 : vector<8x128xf32>
      %34 = arith.negf %33 : vector<8x128xf32>
      %35 = math.exp %34 : vector<8x128xf32>
      %cst_27 = arith.constant 1.000000e+00 : f32
      %36 = vector.broadcast %cst_27 : f32 to vector<8x128xf32>
      %37 = arith.addf %36, %35 : vector<8x128xf32>
      %38 = arith.divf %36, %37 : vector<8x128xf32>
      %39 = vector.extract_strided_slice %17 {offsets = [0, 256], sizes = [8, 128], strides = [1, 1]} : vector<8x384xf32> to vector<8x128xf32>
      %40 = vector.extract_strided_slice %22 {offsets = [0, 256], sizes = [8, 128], strides = [1, 1]} : vector<8x384xf32> to vector<8x128xf32>
      %41 = arith.mulf %30, %40 : vector<8x128xf32>
      %42 = arith.addf %39, %41 : vector<8x128xf32>
      %43 = math.tanh %42 : vector<8x128xf32>
      %cst_28 = arith.constant 1.000000e+00 : f32
      %44 = vector.broadcast %cst_28 : f32 to vector<8x128xf32>
      %45 = arith.subf %44, %38 : vector<8x128xf32>
      %46 = arith.mulf %45, %43 : vector<8x128xf32>
      %47 = arith.mulf %38, %14 : vector<8x128xf32>
      %48 = arith.addf %46, %47 : vector<8x128xf32>
      %c0_29 = arith.constant 0 : index
      %c0_30 = arith.constant 0 : index
      %49 = vector.load %arg7[%c0_29, %c0_30] : memref<8x128xf32, #tpu.memory_space<vmem>>, vector<8x128xf32>
      tpu.vector_store %arg7[%c0_29, %c0_30], %48 {strides = array<i32>} : memref<8x128xf32, #tpu.memory_space<vmem>>, vector<8x128xf32>,
      %50 = arith.index_cast %arg9 : i32 to index
      %c0_31 = arith.constant 0 : index
      %c0_32 = arith.constant 0 : index
      %51 = vector.load %arg5[%50, %c0_31, %c0_32] : memref<8x8x128xf32, #tpu.memory_space<vmem>>, vector<1x8x128xf32>
      %52 = vector.shape_cast %51 : vector<1x8x128xf32> to vector<8x128xf32>
      %53 = vector.shape_cast %48 : vector<8x128xf32> to vector<1x8x128xf32>
      tpu.vector_store %arg5[%50, %c0_31, %c0_32], %53 {strides = array<i32>} : memref<8x8x128xf32, #tpu.memory_space<vmem>>, vector<1x8x128xf32>,
    }
    %c8_i32_12 = arith.constant 8 : i32
    %c0_13 = arith.constant 0 : index
    %c0_14 = arith.constant 0 : index
    %12 = vector.load %arg7[%c0_13, %c0_14] : memref<8x128xf32, #tpu.memory_space<vmem>>, vector<8x128xf32>
    %c0_15 = arith.constant 0 : index
    %c0_16 = arith.constant 0 : index
    %13 = vector.load %arg6[%c0_15, %c0_16] : memref<8x128xf32, #tpu.memory_space<vmem>>, vector<8x128xf32>
    tpu.vector_store %arg6[%c0_15, %c0_16], %12 {strides = array<i32>} : memref<8x128xf32, #tpu.memory_space<vmem>>, vector<8x128xf32>,
    return
  }
}

</mosaic_0001>

<bundles_post_ra>
// kernel: tpu_custom_call.1
= control target key start
LH: loop header
LB: loop body
LE: loop exit
PB: predicated region body
PF: predicated region fallthrough
CT: control target
= control target key end

     0   :  { %12 = vsyncpa [#allocation5], 0  ;;  %s1087_s0 = inlined_call_operand.hbm [shape: f32[8,8,128], index: 0, kind: input, shape index: {}]   ;;  %s1088_s1 = inlined_call_operand.hbm [shape: f32[128,384], index: 1, kind: input, shape index: {}]   ;;  %s1089_s2 = inlined_call_operand.hbm [shape: f32[128,384], index: 2, kind: input, shape index: {}]   ;;  %s1090_s3 = inlined_call_operand.vmem [shape: f32[1,384], index: 3, kind: input, shape index: {}]   ;;  %s1091_s4 = inlined_call_operand.vmem [shape: f32[1,384], index: 4, kind: input, shape index: {}]   ;;  %s1092_s5 = inlined_call_operand.hbm [shape: f32[8,8,128], index: 5, kind: output, shape index: {0}]   ;;  %s1093_s6 = inlined_call_operand.hbm [shape: f32[8,128], index: 6, kind: output, shape index: {1}]  }
   0x1   :  { %13 = vsyncpa [#allocation8], 0 }
   0x2   :  { %14 = vsyncpa [#allocation6], 0 }
   0x3   :  { %15 = vsyncpa [#allocation12], 0  ;;  %s939_s21 = smov [#allocation7]  }
   0x4   :  { %s33_s22 = sshll.u32 %s939_s21, 4  ;;  %s34_s22 = int_to_ptr.vmem [resolvable:$true] %s33_s22 }
   0x5   :  { %s831_s23 = scalar_lea.vmem %s34_s22, 6144  ;;  %p836_p1 = scmp.lt.s32.totalorder %s34_s22, %s34_s22 }
   0x6   :  { %p832_p0 = scmp.ne.s32.totalorder %s34_s22, %s831_s23  ;;  %p837_p2 = scmp.lt.s32.totalorder %s831_s23, %s831_s23 }
   0x8   :  { %p838_p3 = por %p837_p2, %p836_p1 }
   0xa   :  { %p839_p4 = pnand %p838_p3, %p832_p0 }
   0xc   :  { %842 = shalt.err (!%p839_p4)
}
   0xd   :  { %s940_s24 = smov 384   ;;  %s941_s25 = smov 24  }
   0xe   :  { %39 = dma.hbm_to_vmem [thread:$0]  %s1088_s1, 6144, %s34_s22, [#allocation8], %s940_s24, %s940_s24, %s941_s25  }
   0xf   :  { %s942_s28 = smov [#allocation4]  }
  0x10   :  { %s21_s29 = sshll.u32 %s942_s28, 4  ;;  %s22_s29 = int_to_ptr.vmem [resolvable:$true] %s21_s29 }
  0x11   :  { %s851_s30 = scalar_lea.vmem %s22_s29, 1024  ;;  %p856_p6 = scmp.lt.s32.totalorder %s22_s29, %s22_s29 }
  0x12   :  { %p852_p5 = scmp.ne.s32.totalorder %s22_s29, %s851_s30  ;;  %p857_p7 = scmp.lt.s32.totalorder %s851_s30, %s851_s30 }
  0x14   :  { %p858_p8 = por %p857_p7, %p856_p6 }
  0x16   :  { %p859_p9 = pnand %p858_p8, %p852_p5 }
  0x18   :  { %862 = shalt.err (!%p859_p9)
}
  0x19   :  { %s943_s7 = smov 128   ;;  %s944_s8 = smov 8  }
  0x1a   :  { %27 = dma.hbm_to_vmem [thread:$0]  %s1087_s0, 1024, %s22_s29, [#allocation5], %s943_s7, %s943_s7, %s944_s8  }
  0x1b   :  { %s945_s1 = smov [#allocation9]  }
  0x1c   :  { %s45_s11 = sshll.u32 %s945_s1, 4  ;;  %s46_s11 = int_to_ptr.vmem [resolvable:$true] %s45_s11 }
  0x1d   :  { %s871_s12 = scalar_lea.vmem %s46_s11, 6144  ;;  %p876_p11 = scmp.lt.s32.totalorder %s46_s11, %s46_s11 }
  0x1e   :  { %p872_p10 = scmp.ne.s32.totalorder %s46_s11, %s871_s12  ;;  %p877_p12 = scmp.lt.s32.totalorder %s871_s12, %s871_s12 }
  0x20   :  { %p878_p13 = por %p877_p12, %p876_p11 }
  0x22   :  { %p879_p0 = pnand %p878_p13, %p872_p10 }
  0x24   :  { %882 = shalt.err (!%p879_p0)
}
  0x25   :  { %51 = dma.hbm_to_vmem [thread:$0]  %s1089_s2, 6144, %s46_s11, [#allocation8], %s940_s24, %s940_s24, %s941_s25  }
  0x26   :  { %927 = dma.done.wait [#allocation5], 1024  }
  0x27   :  { %928 = vsyncadd [#allocation5], 4294966272 }
  0x28   :  { %929 = dma.done.wait [#allocation8], 12288  }
  0x29   :  { %930 = vsyncadd [#allocation8], 4294955008  ;;  %v946_v0 = vmov 0.0   ;;  %v119_v1 = vld [vmem:[#allocation7 + $0x170] sm:$0xff]  ;;  %v118_v2 = vld [vmem:[#allocation7 + $0x168] sm:$0xff]  ;;  %v123_v57 = vlaneseq }
  0x2a   :  { %202 = vmatprep.mubr.f32.mxu0 %v946_v0  ;;  %380 = vst [vmem:[#allocation2] sm:$0xff] %v946_v0  ;;  %v116_v3 = vld [vmem:[#allocation7 + $0x158] sm:$0xff]  ;;  %138 = vmatprep.subr.mxu0 %v119_v1  ;;  %v115_v4 = vld [vmem:[#allocation7 + $0x150] sm:$0xff]  ;;  %v113_v5 = vld [vmem:[#allocation7 + $0x140] sm:$0xff] }
  0x2b   :  { %139 = vmatpush1.msra.mxu0 %v118_v2  ;;  %v112_v6 = vld [vmem:[#allocation7 + $0x138] sm:$0xff]  ;;  %v110_v7 = vld [vmem:[#allocation7 + $0x128] sm:$0xff]  ;;  %v109_v8 = vld [vmem:[#allocation7 + $0x120] sm:$0xff]  ;;  %v1007_v58 = vshrl.u32 %v123_v57, 7 }
  0x2c   :  { %140 = vmatprep.subr.mxu0 %v116_v3  ;;  %v120_v9 = vld [vmem:[#allocation7 + $0x178] sm:$0xff]  ;;  %v107_v10 = vld [vmem:[#allocation7 + $0x110] sm:$0xff]  ;;  %v117_v11 = vld [vmem:[#allocation7 + $0x160] sm:$0xff] }
  0x2d   :  { %141 = vmatpush1.msra.mxu0 %v115_v4  ;;  %714 = vmatprep.subr.mxu1 %v120_v9  ;;  %v106_v12 = vld [vmem:[#allocation7 + $0x108] sm:$0xff]  ;;  %v104_v14 = vld [vmem:[#allocation7 + $0xf8] sm:$0xff]  ;;  %v103_v15 = vld [vmem:[#allocation7 + $0xf0] sm:$0xff]  ;;  %v125_v59 = vsub.s32 0, %v1007_v58  ;;  %v129_v61 = vsub.s32 1, %v1007_v58  ;;  %v133_v63 = vsub.s32 2, %v1007_v58 }
  0x2e   :  { %142 = vmatprep.subr.mxu0 %v113_v5  ;;  %715 = vmatpush3.msra.mxu1 %v120_v9  ;;  %v114_v13 = vld [vmem:[#allocation7 + $0x148] sm:$0xff]  ;;  %v111_v16 = vld [vmem:[#allocation7 + $0x130] sm:$0xff]  ;;  %v101_v17 = vld [vmem:[#allocation7 + $0xe0] sm:$0xff] }
  0x2f   :  { %143 = vmatpush1.msra.mxu0 %v112_v6  ;;  %716 = vmatprep.subr.mxu1 %v117_v11  ;;  %v100_v18 = vld [vmem:[#allocation7 + $0xd8] sm:$0xff]  ;;  %v98_v20 = vld [vmem:[#allocation7 + $0xc8] sm:$0xff]  ;;  %v97_v21 = vld [vmem:[#allocation7 + $0xc0] sm:$0xff] }
  0x30   :  { %144 = vmatprep.subr.mxu0 %v110_v7  ;;  %717 = vmatpush3.msra.mxu1 %v117_v11  ;;  %v108_v19 = vld [vmem:[#allocation7 + $0x118] sm:$0xff]  ;;  %v105_v22 = vld [vmem:[#allocation7 + $0x100] sm:$0xff]  ;;  %v95_v23 = vld [vmem:[#allocation7 + $0xb0] sm:$0xff] }
  0x31   :  { %145 = vmatpush1.msra.mxu0 %v109_v8  ;;  %718 = vmatprep.subr.mxu1 %v114_v13  ;;  %v94_v24 = vld [vmem:[#allocation7 + $0xa8] sm:$0xff]  ;;  %v92_v26 = vld [vmem:[#allocation7 + $0x98] sm:$0xff]  ;;  %v91_v27 = vld [vmem:[#allocation7 + $0x90] sm:$0xff] }
  0x32   :  { %146 = vmatprep.subr.mxu0 %v107_v10  ;;  %719 = vmatpush3.msra.mxu1 %v114_v13  ;;  %v102_v25 = vld [vmem:[#allocation7 + $0xe8] sm:$0xff]  ;;  %v99_v28 = vld [vmem:[#allocation7 + $0xd0] sm:$0xff]  ;;  %v89_v29 = vld [vmem:[#allocation7 + $0x80] sm:$0xff] }
  0x33   :  { %147 = vmatpush1.msra.mxu0 %v106_v12  ;;  %720 = vmatprep.subr.mxu1 %v111_v16  ;;  %v88_v30 = vld [vmem:[#allocation7 + $0x78] sm:$0xff]  ;;  %v86_v32 = vld [vmem:[#allocation7 + $0x68] sm:$0xff]  ;;  %v85_v33 = vld [vmem:[#allocation7 + $0x60] sm:$0xff] }
  0x34   :  { %148 = vmatprep.subr.mxu0 %v104_v14  ;;  %721 = vmatpush3.msra.mxu1 %v111_v16  ;;  %v96_v31 = vld [vmem:[#allocation7 + $0xb8] sm:$0xff]  ;;  %v93_v34 = vld [vmem:[#allocation7 + $0xa0] sm:$0xff]  ;;  %v83_v35 = vld [vmem:[#allocation7 + $0x50] sm:$0xff] }
  0x35   :  { %149 = vmatpush1.msra.mxu0 %v103_v15  ;;  %722 = vmatprep.subr.mxu1 %v108_v19  ;;  %v82_v36 = vld [vmem:[#allocation7 + $0x48] sm:$0xff]  ;;  %v80_v38 = vld [vmem:[#allocation7 + $0x38] sm:$0xff]  ;;  %v79_v39 = vld [vmem:[#allocation7 + $0x30] sm:$0xff] }
  0x36   :  { %150 = vmatprep.subr.mxu0 %v101_v17  ;;  %723 = vmatpush3.msra.mxu1 %v108_v19  ;;  %v90_v37 = vld [vmem:[#allocation7 + $0x88] sm:$0xff]  ;;  %v87_v40 = vld [vmem:[#allocation7 + $0x70] sm:$0xff]  ;;  %v77_v41 = vld [vmem:[#allocation7 + $0x20] sm:$0xff] }
  0x37   :  { %151 = vmatpush1.msra.mxu0 %v100_v18  ;;  %724 = vmatprep.subr.mxu1 %v105_v22  ;;  %v76_v42 = vld [vmem:[#allocation7 + $0x18] sm:$0xff]  ;;  %v74_v44 = vld [vmem:[#allocation7 + $0x8] sm:$0xff]  ;;  %v73_v45 = vld [vmem:[#allocation7] sm:$0xff] }
  0x38   :  { %152 = vmatprep.subr.mxu0 %v98_v20  ;;  %725 = vmatpush3.msra.mxu1 %v105_v22  ;;  %v84_v43 = vld [vmem:[#allocation7 + $0x58] sm:$0xff]  ;;  %v81_v46 = vld [vmem:[#allocation7 + $0x40] sm:$0xff]  ;;  %v78_v48 = vld [vmem:[#allocation7 + $0x28] sm:$0xff] }
  0x39   :  { %153 = vmatpush1.msra.mxu0 %v97_v21  ;;  %726 = vmatprep.subr.mxu1 %v102_v25  ;;  %v65_v47 = vld [vmem:[#allocation4] sm:$0xff]  ;;  %v75_v49 = vld [vmem:[#allocation7 + $0x10] sm:$0xff]  ;;  %v66_v50 = vld [vmem:[#allocation4 + $0x8] sm:$0xff] }
  0x3a   :  { %154 = vmatprep.subr.mxu0 %v95_v23  ;;  %727 = vmatpush3.msra.mxu1 %v102_v25  ;;  %v67_v51 = vld [vmem:[#allocation4 + $0x10] sm:$0xff]  ;;  %v68_v52 = vld [vmem:[#allocation4 + $0x18] sm:$0xff]  ;;  %v69_v53 = vld [vmem:[#allocation4 + $0x20] sm:$0xff] }
  0x3b   :  { %155 = vmatpush1.msra.mxu0 %v94_v24  ;;  %728 = vmatprep.subr.mxu1 %v99_v28  ;;  %v71_v54 = vld [vmem:[#allocation4 + $0x30] sm:$0xff]  ;;  %v70_v55 = vld [vmem:[#allocation4 + $0x28] sm:$0xff]  ;;  %v72_v56 = vld [vmem:[#allocation4 + $0x38] sm:$0xff] }
  0x3c   :  { %156 = vmatprep.subr.mxu0 %v92_v26  ;;  %729 = vmatpush3.msra.mxu1 %v99_v28  ;;  %v121_v60 = vld [vmem:[%s1090_s3] sm:$0x7]  ;;  %s1041_s3 = smov 0  }
  0x3d   :  { %157 = vmatpush1.msra.mxu0 %v91_v27  ;;  %730 = vmatprep.subr.mxu1 %v96_v31  ;;  %v1016_v62 = vrot.slane %v121_v60, %v125_v59  ;;  %v134_v4 = vrot.slane %v121_v60, %v133_v63 }
  0x3e   :  { %158 = vmatprep.subr.mxu0 %v89_v29  ;;  %731 = vmatpush3.msra.mxu1 %v96_v31 }
  0x3f   :  { %159 = vmatpush1.msra.mxu0 %v88_v30  ;;  %732 = vmatprep.subr.mxu1 %v93_v34 }
  0x40   :  { %160 = vmatprep.subr.mxu0 %v86_v32  ;;  %733 = vmatpush3.msra.mxu1 %v93_v34 }
  0x41   :  { %161 = vmatpush1.msra.mxu0 %v85_v33  ;;  %734 = vmatprep.subr.mxu1 %v90_v37 }
  0x42   :  { %162 = vmatprep.subr.mxu0 %v83_v35  ;;  %735 = vmatpush3.msra.mxu1 %v90_v37 }
  0x43   :  { %163 = vmatpush1.msra.mxu0 %v82_v36  ;;  %736 = vmatprep.subr.mxu1 %v87_v40 }
  0x44   :  { %164 = vmatprep.subr.mxu0 %v80_v38  ;;  %737 = vmatpush3.msra.mxu1 %v87_v40 }
  0x45   :  { %165 = vmatpush1.msra.mxu0 %v79_v39  ;;  %738 = vmatprep.subr.mxu1 %v84_v43 }
  0x46   :  { %166 = vmatprep.subr.mxu0 %v77_v41  ;;  %739 = vmatpush3.msra.mxu1 %v84_v43 }
  0x47   :  { %167 = vmatpush1.msra.mxu0 %v76_v42  ;;  %740 = vmatprep.subr.mxu1 %v81_v46 }
  0x48   :  { %168 = vmatprep.subr.mxu0 %v74_v44  ;;  %741 = vmatpush3.msra.mxu1 %v81_v46 }
  0x49   :  { %169 = vmatpush1.msra.mxu0 %v73_v45  ;;  %742 = vmatprep.subr.mxu1 %v78_v48 }
  0x4a   :  { %203 = vmatmul.mubr.f32.vlgmr.msra.gmra.mxu0 %v65_v47  ;;  %743 = vmatpush3.msra.mxu1 %v78_v48 }
  0x4b   :  { %208 = vmatprep.mubr.f32.mxu0 %v946_v0  ;;  %746 = vmatprep.mubr.f32.mxu1 %v65_v47 }
  0x4c   :  { %744 = vmatprep.subr.mxu1 %v75_v49 }
  0x4d   :  { %745 = vmatpush3.msra.mxu1 %v75_v49 }
  0x4e   :  { %209 = vmatmul.mubr.f32.gmra.mxu0 %v66_v50  ;;  %747 = vmatmul.mubr.f32.vlgmr.msra.gmra.mxu1 %v66_v50 }
  0x4f   :  { %214 = vmatprep.mubr.f32.mxu0 %v946_v0  ;;  %749 = vmatprep.mubr.f32.mxu1 %v67_v51 }
  0x52   :  { %215 = vmatmul.mubr.f32.gmra.mxu0 %v67_v51  ;;  %750 = vmatmul.mubr.f32.gmra.mxu1 %v68_v52 }
  0x53   :  { %220 = vmatprep.mubr.f32.mxu0 %v946_v0  ;;  %752 = vmatprep.mubr.f32.mxu1 %v69_v53 }
  0x56   :  { %221 = vmatmul.mubr.f32.gmra.mxu0 %v68_v52  ;;  %753 = vmatmul.mubr.f32.gmra.mxu1 %v70_v55 }
  0x57   :  { %226 = vmatprep.mubr.f32.mxu0 %v946_v0  ;;  %755 = vmatprep.mubr.f32.mxu1 %v71_v54 }
  0x5a   :  { %227 = vmatmul.mubr.f32.gmra.mxu0 %v69_v53  ;;  %756 = vmatmul.mubr.f32.gmra.mxu1 %v72_v56 }
  0x5b   :  { %232 = vmatprep.mubr.f32.mxu0 %v946_v0 }
  0x5e   :  { %233 = vmatmul.mubr.f32.gmra.mxu0 %v70_v55 }
  0x5f   :  { %238 = vmatprep.mubr.f32.mxu0 %v946_v0 }
  0x62   :  { %239 = vmatmul.mubr.f32.gmra.mxu0 %v71_v54 }
  0x63   :  { %244 = vmatprep.mubr.f32.mxu0 %v946_v0  ;;  %v1021_v0 = vrot.slane %v121_v60, %v129_v61 }
  0x66   :  { %245 = vmatmul.mubr.f32.gmra.mxu0 %v72_v56 }
 0x10a   :  { %v204_v1 = vpop.f32.mrf.mxu0 }
 0x10b   :  { %v205_v2 = vadd.f32 %v204_v1, %v1016_v62 }
 0x10c   :  { %v206_v3 = vpop.f32.mrf.mxu0 }
 0x10d   :  { %356 = vst [vmem:[#allocation3] sm:$0xff] %v205_v2  ;;  %v207_v5 = vadd.f32 %v206_v3, %v1021_v0 }
 0x10e   :  { %v210_v6 = vpop.f32.mrf.mxu0  ;;  %v748_v8 = vpop.f32.mrf.mxu1 }
 0x10f   :  { %357 = vst [vmem:[#allocation3 + $0x8] sm:$0xff] %v207_v5  ;;  %v211_v7 = vadd.f32 %v210_v6, %v1016_v62  ;;  %v323_v10 = vadd.f32 %v748_v8, %v134_v4 }
 0x110   :  { %v212_v9 = vpop.f32.mrf.mxu0  ;;  %v317_v12 = vpop.f32.mrf.mxu1 }
 0x111   :  { %359 = vst [vmem:[#allocation3 + $0x18] sm:$0xff] %v211_v7  ;;  %v213_v11 = vadd.f32 %v212_v9, %v1021_v0  ;;  %361 = vst [vmem:[#allocation3 + $0x28] sm:$0xff] %v323_v10  ;;  %v318_v14 = vadd.f32 %v317_v12, %v134_v4 }
 0x112   :  { %v216_v13 = vpop.f32.mrf.mxu0  ;;  %v751_v16 = vpop.f32.mrf.mxu1 }
 0x113   :  { %360 = vst [vmem:[#allocation3 + $0x20] sm:$0xff] %v213_v11  ;;  %v217_v15 = vadd.f32 %v216_v13, %v1016_v62  ;;  %358 = vst [vmem:[#allocation3 + $0x10] sm:$0xff] %v318_v14  ;;  %v333_v18 = vadd.f32 %v751_v16, %v134_v4 }
 0x114   :  { %v218_v17 = vpop.f32.mrf.mxu0  ;;  %v327_v20 = vpop.f32.mrf.mxu1 }
 0x115   :  { %362 = vst [vmem:[#allocation3 + $0x30] sm:$0xff] %v217_v15  ;;  %v219_v19 = vadd.f32 %v218_v17, %v1021_v0  ;;  %367 = vst [vmem:[#allocation3 + $0x58] sm:$0xff] %v333_v18  ;;  %v328_v22 = vadd.f32 %v327_v20, %v134_v4 }
 0x116   :  { %v222_v21 = vpop.f32.mrf.mxu0  ;;  %v754_v24 = vpop.f32.mrf.mxu1 }
 0x117   :  { %363 = vst [vmem:[#allocation3 + $0x38] sm:$0xff] %v219_v19  ;;  %v223_v23 = vadd.f32 %v222_v21, %v1016_v62  ;;  %364 = vst [vmem:[#allocation3 + $0x40] sm:$0xff] %v328_v22  ;;  %v343_v26 = vadd.f32 %v754_v24, %v134_v4 }
 0x118   :  { %v224_v25 = vpop.f32.mrf.mxu0  ;;  %v337_v28 = vpop.f32.mrf.mxu1 }
 0x119   :  { %365 = vst [vmem:[#allocation3 + $0x48] sm:$0xff] %v223_v23  ;;  %v225_v27 = vadd.f32 %v224_v25, %v1021_v0  ;;  %373 = vst [vmem:[#allocation3 + $0x88] sm:$0xff] %v343_v26  ;;  %v338_v30 = vadd.f32 %v337_v28, %v134_v4 }
 0x11a   :  { %v228_v29 = vpop.f32.mrf.mxu0  ;;  %v757_v32 = vpop.f32.mrf.mxu1 }
 0x11b   :  { %366 = vst [vmem:[#allocation3 + $0x50] sm:$0xff] %v225_v27  ;;  %v229_v31 = vadd.f32 %v228_v29, %v1016_v62  ;;  %370 = vst [vmem:[#allocation3 + $0x70] sm:$0xff] %v338_v30  ;;  %v353_v34 = vadd.f32 %v757_v32, %v134_v4 }
 0x11c   :  { %v230_v33 = vpop.f32.mrf.mxu0  ;;  %v347_v36 = vpop.f32.mrf.mxu1 }
 0x11d   :  { %368 = vst [vmem:[#allocation3 + $0x60] sm:$0xff] %v229_v31  ;;  %v231_v35 = vadd.f32 %v230_v33, %v1021_v0  ;;  %379 = vst [vmem:[#allocation3 + $0xb8] sm:$0xff] %v353_v34  ;;  %v348_v38 = vadd.f32 %v347_v36, %v134_v4 }
 0x11e   :  { %v234_v37 = vpop.f32.mrf.mxu0 }
 0x11f   :  { %369 = vst [vmem:[#allocation3 + $0x68] sm:$0xff] %v231_v35  ;;  %v235_v39 = vadd.f32 %v234_v37, %v1016_v62  ;;  %376 = vst [vmem:[#allocation3 + $0xa0] sm:$0xff] %v348_v38 }
 0x120   :  { %v236_v40 = vpop.f32.mrf.mxu0 }
 0x121   :  { %371 = vst [vmem:[#allocation3 + $0x78] sm:$0xff] %v235_v39  ;;  %v237_v41 = vadd.f32 %v236_v40, %v1021_v0 }
 0x122   :  { %v240_v42 = vpop.f32.mrf.mxu0 }
 0x123   :  { %372 = vst [vmem:[#allocation3 + $0x80] sm:$0xff] %v237_v41  ;;  %v241_v43 = vadd.f32 %v240_v42, %v1016_v62 }
 0x124   :  { %v242_v44 = vpop.f32.mrf.mxu0 }
 0x125   :  { %374 = vst [vmem:[#allocation3 + $0x90] sm:$0xff] %v241_v43  ;;  %v243_v45 = vadd.f32 %v242_v44, %v1021_v0 }
 0x126   :  { %v246_v46 = vpop.f32.mrf.mxu0 }
 0x127   :  { %375 = vst [vmem:[#allocation3 + $0x98] sm:$0xff] %v243_v45  ;;  %v247_v47 = vadd.f32 %v246_v46, %v1016_v62 }
 0x128   :  { %v248_v48 = vpop.f32.mrf.mxu0 }
 0x129   :  { %377 = vst [vmem:[#allocation3 + $0xa8] sm:$0xff] %v247_v47  ;;  %v249_v49 = vadd.f32 %v248_v48, %v1021_v0 }
 0x12b   :  { %378 = vst [vmem:[#allocation3 + $0xb0] sm:$0xff] %v249_v49 }
 0x12c LB: > { %v440_v50 = vld [vmem:[#allocation9 + $0x170] sm:$0xff]  ;;  %v439_v51 = vld [vmem:[#allocation9 + $0x168] sm:$0xff]  ;;  %v437_v52 = vld [vmem:[#allocation9 + $0x158] sm:$0xff]  ;;  %v947_v54 = vmov 0.0   ;;  %vm948_vm0 = vmmov 0   ;;  %s672_s15 = smul.u32 24, %s937_s3  ;;  %s937_s3 = sphi %s1041_s3, %s386_s3  }
 0x12d   : > { %459 = vmatprep.subr.mxu0 %v440_v50  ;;  %v436_v53 = vld [vmem:[#allocation9 + $0x150] sm:$0xff]  ;;  %523 = vmatprep.mubr.f32.mxu0 %v947_v54  ;;  %v434_v55 = vld [vmem:[#allocation9 + $0x140] sm:$0xff]  ;;  %v433_v56 = vld [vmem:[#allocation9 + $0x138] sm:$0xff]  ;;  %s671_s19 = sshll.u32 %s937_s3, 3  ;;  %s386_s3 = sadd.s32 1, %s937_s3  }
 0x12e   : > { %460 = vmatpush1.msra.mxu0 %v439_v51  ;;  %758 = vmatprep.subr.mxu1 %v947_v54  ;;  %v431_v57 = vld [vmem:[#allocation9 + $0x128] sm:$0xff]  ;;  %v430_v60 = vld [vmem:[#allocation9 + $0x120] sm:$0xff]  ;;  %v428_v62 = vld [vmem:[#allocation9 + $0x110] sm:$0xff]  ;;  %s390_s18 = scalar_lea.vmem [#allocation3], %s672_s15  ;;  %s623_s20 = scalar_lea.vmem [#allocation10], %s671_s19 }
 0x12f   : > { %461 = vmatprep.subr.mxu0 %v437_v52  ;;  %790 = vmatprep.mubr.msk.f32.mxu1 %vm948_vm0, %v947_v54  ;;  %v427_v0 = vld [vmem:[#allocation9 + $0x108] sm:$0xff]  ;;  %v425_v1 = vld [vmem:[#allocation9 + $0xf8] sm:$0xff]  ;;  %v424_v2 = vld [vmem:[#allocation9 + $0xf0] sm:$0xff]  ;;  %p383_p1 = scmp.ge.s32.totalorder %s386_s3, 8  }
 0x130   : > { %462 = vmatpush1.msra.mxu0 %v436_v53  ;;  %v422_v3 = vld [vmem:[#allocation9 + $0xe0] sm:$0xff]  ;;  %v421_v4 = vld [vmem:[#allocation9 + $0xd8] sm:$0xff]  ;;  %v419_v7 = vld [vmem:[#allocation9 + $0xc8] sm:$0xff]  ;;  %s949_s21 = smov (%p383_p1), [#allocation10]   ;;  %s950_s23 = smov (%p383_p1), [#allocation11]  }
 0x131   : > { %463 = vmatprep.subr.mxu0 %v434_v55  ;;  %v441_v5 = vld [vmem:[#allocation9 + $0x178] sm:$0xff]  ;;  %v438_v6 = vld [vmem:[#allocation9 + $0x160] sm:$0xff]  ;;  %v435_v9 = vld [vmem:[#allocation9 + $0x148] sm:$0xff]  ;;  %s632_s22 = sshll.u32 (%p383_p1), %s949_s21, 4  ;;  %s645_s24 = sshll.u32 (%p383_p1), %s950_s23, 4  ;;  %s633_s22 = int_to_ptr.vmem [resolvable:$true] %s632_s22  ;;  %s646_s24 = int_to_ptr.vmem [resolvable:$true] %s645_s24 }
 0x132   : > { %464 = vmatpush1.msra.mxu0 %v433_v56  ;;  %759 = vmatpush3.msra.mxu1 %v441_v5  ;;  %v418_v8 = vld [vmem:[#allocation9 + $0xc0] sm:$0xff]  ;;  %v416_v10 = vld [vmem:[#allocation9 + $0xb0] sm:$0xff]  ;;  %v415_v11 = vld [vmem:[#allocation9 + $0xa8] sm:$0xff]  ;;  %s883_s25 = scalar_lea.vmem (%p383_p1), %s633_s22, 1024  ;;  %p888_p3 = scmp.lt.s32.totalorder (%p383_p1), %s633_s22, %s633_s22 }
 0x133   : > { %465 = vmatprep.subr.mxu0 %v431_v57  ;;  %760 = vmatprep.subr.mxu1 %v947_v54  ;;  %v432_v12 = vld [vmem:[#allocation9 + $0x130] sm:$0xff]  ;;  %v413_v13 = vld [vmem:[#allocation9 + $0x98] sm:$0xff]  ;;  %v410_v16 = vld [vmem:[#allocation9 + $0x80] sm:$0xff]  ;;  %p884_p2 = scmp.ne.s32.totalorder (%p383_p1), %s633_s22, %s883_s25  ;;  %p889_p4 = scmp.lt.s32.totalorder (%p383_p1), %s883_s25, %s883_s25 }
 0x134   : > { %466 = vmatpush1.msra.mxu0 %v430_v60  ;;  %761 = vmatpush3.msra.mxu1 %v438_v6  ;;  %v412_v14 = vld [vmem:[#allocation9 + $0x90] sm:$0xff]  ;;  %v429_v15 = vld [vmem:[#allocation9 + $0x118] sm:$0xff]  ;;  %v426_v18 = vld [vmem:[#allocation9 + $0x100] sm:$0xff] }
 0x135   : > { %467 = vmatprep.subr.mxu0 %v428_v62  ;;  %762 = vmatprep.subr.mxu1 %v947_v54  ;;  %v409_v17 = vld [vmem:[#allocation9 + $0x78] sm:$0xff]  ;;  %v407_v19 = vld [vmem:[#allocation9 + $0x68] sm:$0xff]  ;;  %v406_v20 = vld [vmem:[#allocation9 + $0x60] sm:$0xff]  ;;  %p890_p5 = por (%p383_p1), %p889_p4, %p888_p3 }
 0x136   : > { %468 = vmatpush1.msra.mxu0 %v427_v0  ;;  %763 = vmatpush3.msra.mxu1 %v435_v9  ;;  %v423_v21 = vld [vmem:[#allocation9 + $0xe8] sm:$0xff]  ;;  %v404_v22 = vld [vmem:[#allocation9 + $0x50] sm:$0xff]  ;;  %v401_v25 = vld [vmem:[#allocation9 + $0x38] sm:$0xff] }
 0x137   : > { %469 = vmatprep.subr.mxu0 %v425_v1  ;;  %764 = vmatprep.subr.mxu1 %v947_v54  ;;  %v403_v23 = vld [vmem:[#allocation9 + $0x48] sm:$0xff]  ;;  %v420_v24 = vld [vmem:[#allocation9 + $0xd0] sm:$0xff]  ;;  %v417_v27 = vld [vmem:[#allocation9 + $0xb8] sm:$0xff]  ;;  %p891_p6 = pnand (%p383_p1), %p890_p5, %p884_p2 }
 0x138   : > { %470 = vmatpush1.msra.mxu0 %v424_v2  ;;  %765 = vmatpush3.msra.mxu1 %v432_v12  ;;  %v400_v26 = vld [vmem:[#allocation9 + $0x30] sm:$0xff]  ;;  %v398_v28 = vld [vmem:[#allocation9 + $0x20] sm:$0xff]  ;;  %v397_v29 = vld [vmem:[#allocation9 + $0x18] sm:$0xff] }
 0x139   : > { %471 = vmatprep.subr.mxu0 %v422_v3  ;;  %766 = vmatprep.subr.mxu1 %v947_v54  ;;  %v414_v30 = vld [vmem:[#allocation9 + $0xa0] sm:$0xff]  ;;  %v395_v31 = vld [vmem:[#allocation9 + $0x8] sm:$0xff]  ;;  %v387_v34 = vld [vmem:[#allocation2] sm:$0xff] }
 0x13a   : > { %472 = vmatpush1.msra.mxu0 %v421_v4  ;;  %767 = vmatpush3.msra.mxu1 %v429_v15  ;;  %v394_v32 = vld [vmem:[#allocation9] sm:$0xff]  ;;  %v411_v33 = vld [vmem:[#allocation9 + $0x88] sm:$0xff]  ;;  %v408_v35 = vld [vmem:[#allocation9 + $0x70] sm:$0xff] }
 0x13b   : > { %473 = vmatprep.subr.mxu0 %v419_v7  ;;  %768 = vmatprep.subr.mxu1 %v947_v54  ;;  %v405_v36 = vld [vmem:[#allocation9 + $0x58] sm:$0xff]  ;;  %v402_v37 = vld [vmem:[#allocation9 + $0x40] sm:$0xff]  ;;  %v399_v38 = vld [vmem:[#allocation9 + $0x28] sm:$0xff] }
 0x13c   : > { %474 = vmatpush1.msra.mxu0 %v418_v8  ;;  %769 = vmatpush3.msra.mxu1 %v426_v18  ;;  %v396_v39 = vld [vmem:[#allocation9 + $0x10] sm:$0xff]  ;;  %v442_v40 = vld [vmem:[%s1091_s4] sm:$0x7]  ;;  %v392_v50 = vld [vmem:[%s390_s18 + $0x8] sm:$0xff] }
 0x13d   : > { %475 = vmatprep.subr.mxu0 %v416_v10  ;;  %770 = vmatprep.subr.mxu1 %v947_v54  ;;  %v447_v41 = vrot.slane %v442_v40, %v125_v59  ;;  %v391_v42 = vld [vmem:[%s390_s18] sm:$0xff]  ;;  %v451_v45 = vrot.slane %v442_v40, %v129_v61  ;;  %v455_v57 = vrot.slane %v442_v40, %v133_v63  ;;  %v393_v2 = vld [vmem:[%s390_s18 + $0x10] sm:$0xff] }
 0x13e   : > { %476 = vmatpush1.msra.mxu0 %v415_v11  ;;  %771 = vmatpush3.msra.mxu1 %v423_v21 }
 0x13f   : > { %477 = vmatprep.subr.mxu0 %v413_v13  ;;  %772 = vmatprep.subr.mxu1 %v947_v54 }
 0x140   : > { %478 = vmatpush1.msra.mxu0 %v412_v14  ;;  %773 = vmatpush3.msra.mxu1 %v420_v24 }
 0x141   : > { %479 = vmatprep.subr.mxu0 %v410_v16  ;;  %774 = vmatprep.subr.mxu1 %v947_v54 }
 0x142   : > { %480 = vmatpush1.msra.mxu0 %v409_v17  ;;  %775 = vmatpush3.msra.mxu1 %v417_v27 }
 0x143   : > { %481 = vmatprep.subr.mxu0 %v407_v19  ;;  %776 = vmatprep.subr.mxu1 %v947_v54 }
 0x144   : > { %482 = vmatpush1.msra.mxu0 %v406_v20  ;;  %777 = vmatpush3.msra.mxu1 %v414_v30 }
 0x145   : > { %483 = vmatprep.subr.mxu0 %v404_v22  ;;  %778 = vmatprep.subr.mxu1 %v947_v54 }
 0x146   : > { %484 = vmatpush1.msra.mxu0 %v403_v23  ;;  %779 = vmatpush3.msra.mxu1 %v411_v33 }
 0x147   : > { %485 = vmatprep.subr.mxu0 %v401_v25  ;;  %780 = vmatprep.subr.mxu1 %v947_v54 }
 0x148   : > { %486 = vmatpush1.msra.mxu0 %v400_v26  ;;  %781 = vmatpush3.msra.mxu1 %v408_v35 }
 0x149   : > { %487 = vmatprep.subr.mxu0 %v398_v28  ;;  %782 = vmatprep.subr.mxu1 %v947_v54 }
 0x14a   : > { %488 = vmatpush1.msra.mxu0 %v397_v29  ;;  %783 = vmatpush3.msra.mxu1 %v405_v36 }
 0x14b   : > { %489 = vmatprep.subr.mxu0 %v395_v31  ;;  %784 = vmatprep.subr.mxu1 %v947_v54 }
 0x14c   : > { %490 = vmatpush1.msra.mxu0 %v394_v32  ;;  %785 = vmatpush3.msra.mxu1 %v402_v37 }
 0x14d   : > { %524 = vmatmul.mubr.f32.vlgmr.msra.gmra.mxu0 %v387_v34  ;;  %786 = vmatprep.subr.mxu1 %v947_v54 }
 0x14e   : > { %787 = vmatpush3.msra.mxu1 %v399_v38 }
 0x14f   : > { %788 = vmatprep.subr.mxu1 %v947_v54 }
 0x150   : > { %789 = vmatpush3.msra.mxu1 %v396_v39 }
 0x151   : > { %791 = vmatmul.mubr.f32.vlgmr.msra.gmra.mxu1 %v387_v34 }
 0x20d   : > { %v525_v43 = vpop.f32.mrf.mxu0 }
 0x20e   : > { %v526_v44 = vadd.f32 %v525_v43, %v447_v41 }
 0x20f   : > { %v527_v46 = vpop.f32.mrf.mxu0 }
 0x210   : > { %v600_v47 = vadd.f32 %v526_v44, %v391_v42  ;;  %v528_v49 = vadd.f32 %v527_v46, %v451_v45 }
 0x211   : > { %v596_v52 = vpop.f32.mrf.mxu1 }
 0x212   : > { %v669_v48 = vmul.f32 -1.442695, %v600_v47  ;;  %v607_v51 = vadd.f32 %v528_v49, %v392_v50  ;;  %v597_v0 = vadd.f32 %v596_v52, %v455_v57 }
 0x213   : > { %v792_v53 = vpop.f32.mrf.mxu1 }
 0x214   : > { %813 = vpow2.f32 %v669_v48  ;;  %v670_v54 = vmul.f32 -1.442695, %v607_v51 }
 0x216   : > { %815 = vpow2.f32 %v670_v54 }
 0x221   : > { %v814_v55 = vpop.eup %813 }
 0x222   : > { %v604_v56 = vadd.f32 1.0, %v814_v55 }
 0x223   : > { %v816_v60 = vpop.eup %815 }
 0x224   : > { %817 = vrcp.f32 %v604_v56  ;;  %v611_v62 = vadd.f32 1.0, %v816_v60 }
 0x226   : > { %819 = vrcp.f32 %v611_v62 }
 0x231   : > { %v818_v1 = vpop.eup %817 }
 0x232   : > { %v614_v3 = vmul.f32 %v818_v1, %v597_v0 }
 0x233   : > { %v820_v5 = vpop.eup %819 }
 0x234   : > { %v615_v4 = vadd.f32 %v614_v3, %v393_v2  ;;  %v617_v6 = vsub.f32 1.0, %v820_v5  ;;  %v619_v8 = vmul.f32 %v820_v5, %v387_v34 }
 0x236   : > { %821 = vtanh.f32 %v615_v4 }
 0x243   : > { %v822_v7 = vpop.eup %821 }
 0x244   : > { %v618_v9 = vmul.f32 %v822_v7, %v617_v6  ;;  %385 = sbr.rel (!%p383_p1) target bundleno = 300 (0x12c), region = 69 }
 0x246   : > { %v620_v10 = vadd.f32 %v619_v8, %v618_v9 }
 0x248   : > { %621 = vst [vmem:[#allocation2] sm:$0xff] %v620_v10  ;;  %624 = vst [vmem:[%s623_s20] sm:$0xff] %v620_v10 }
 0x24f   :  { %v625_v11 = vld [vmem:[#allocation2] sm:$0xff] }
 0x250   :  { %626 = vst [vmem:[#allocation11] sm:$0xff] %v625_v11 }
 0x251   :  { %894 = shalt.err (!%p891_p6)
}
 0x252   :  { %638 = dma.vmem_to_hbm [thread:$0]  %s633_s22, 1024, %s1092_s5, [#allocation6], %s943_s7, %s943_s7, %s944_s8  }
 0x253   :  { %s903_s4 = scalar_lea.vmem %s646_s24, 128  ;;  %p908_p8 = scmp.lt.s32.totalorder %s646_s24, %s646_s24 }
 0x254   :  { %p904_p7 = scmp.ne.s32.totalorder %s646_s24, %s903_s4  ;;  %p909_p9 = scmp.lt.s32.totalorder %s903_s4, %s903_s4 }
 0x256   :  { %p910_p10 = por %p909_p9, %p908_p8 }
 0x258   :  { %p911_p11 = pnand %p910_p10, %p904_p7 }
 0x25a   :  { %914 = shalt.err (!%p911_p11)
}
 0x25b   :  { %648 = dma.vmem_to_hbm [thread:$0]  %s646_s24, 128, %s1093_s6, [#allocation12]  }
 0x25c   :  { %931 = dma.done.wait [#allocation6], 1024  }
 0x25d   :  { %932 = vsyncadd [#allocation6], 4294966272 }
 0x25e   :  { %933 = dma.done.wait [#allocation12], 128  }
 0x25f   :  { %934 = vsyncadd [#allocation12], 4294967168 }
 0x260   :  { %655 = vsyncpa [#allocation5], 1 }
 0x261   :  { %656 = vsyncpa [#allocation8], 1 }
 0x262   :  { %657 = vsyncpa [#allocation6], 1 }
 0x263   :  { %658 = vsyncpa [#allocation12], 1 }

</bundles_post_ra>
